<compile_context>
chip_gen: v6e
topology: v6e:2x2x1
jax: 0.10.0
libtpu: 0.0.40
codegen_flags: <defaults>
</compile_context>

<pallas_src>
import jax
import jax.numpy as jnp
from jax.experimental import pallas as pl
from jax.experimental.pallas import tpu as pltpu


# ----------------------------------------------------------------------------- schedule
def make_diffusion_schedule(num_steps=1000):
    """Linear beta schedule, same as guided_diffusion with noise_schedule='linear'."""
    scale = 1000.0 / num_steps
    betas = jnp.linspace(scale * 1e-4, scale * 2e-2, num_steps, dtype=jnp.float32)
    alphas_cumprod = jnp.cumprod(1.0 - betas)
    return dict(
        sqrt_alphas_cumprod=jnp.sqrt(alphas_cumprod),
        sqrt_one_minus_alphas_cumprod=jnp.sqrt(1.0 - alphas_cumprod),
        sqrt_recip_alphas_cumprod=jnp.sqrt(1.0 / alphas_cumprod),
        sqrt_recipm1_alphas_cumprod=jnp.sqrt(1.0 / alphas_cumprod - 1.0),
    )


# ----------------------------------------------------------------------------- wrapper
def diffusion_robust_forward(x_nchw, t, noise_nchw, params, tile_hw=None):
    B, C, H, W = x_nchw.shape
    HW = H * W
    NC = params["w_cls"].shape[1]

    # Pick a lane-dense spatial tile (largest divisor of HW that is a multiple of
    # 128 and fits comfortably in VMEM with double buffering).
    if tile_hw is None:
        if HW % 128 == 0:
            tile_hw = min(HW, 8192)
            while HW % tile_hw != 0:
                tile_hw -= 128
        else:
            tile_hw = HW
    assert HW % tile_hw == 0
    n_hw = HW // tile_hw

    # NCHW -> (B, C, HW): channels on sublanes, large spatial axis on lanes.
    x = x_nchw.reshape(B, C, HW).astype(jnp.float32)
    # TODO(synk): noise could be generated in-kernel via pltpu.prng_seed /
    # pltpu.stateful_normal to halve input HBM traffic, but that would not match
    # externally supplied torch.randn_like noise bit-for-bit.
    noise = noise_nchw.reshape(B, C, HW).astype(jnp.float32)

    c0 = params["sqrt_alphas_cumprod"][t]
    c1 = params["sqrt_one_minus_alphas_cumprod"][t]
    c2 = params["sqrt_recip_alphas_cumprod"][t]
    c3 = params["sqrt_recipm1_alphas_cumprod"][t]
    # Fold the "*2 - 1" input rescale into q_sample:
    #   x_t = c0*(2x - 1) + c1*noise = (2*c0)*x + c1*noise - c0
    coefs = jnp.stack([2.0 * c0, c1, c0, c2, c3]).astype(jnp.float32)  # (5,) -> SMEM

    w_eps_t = params["w_eps"].T.astype(jnp.float32)       # (C_out, C_in)
    w_cls = params["w_cls"].astype(jnp.float32)           # (C, NC)
    b_cls = params["b_cls"].astype(jnp.float32)           # (1, NC)

    inv_hw = 1.0 / float(HW)

    def kernel(coef_ref, x_ref, noise_ref, w_t_ref, w_cls_ref, b_cls_ref,
               out_ref, acc_ref):
        h = pl.program_id(1)
        n_h = pl.num_programs(1)

        @pl.when(h == 0)
        def _init():
            acc_ref[...] = jnp.zeros_like(acc_ref)

        a = coef_ref[0]     # 2 * sqrt(acp[t])
        b = coef_ref[1]     # sqrt(1 - acp[t])
        d = coef_ref[2]     # sqrt(acp[t])          (subtracted constant)
        c2k = coef_ref[3]   # sqrt(1 / acp[t])
        c3k = coef_ref[4]   # sqrt(1 / acp[t] - 1)

        xt = x_ref[0]          # (C, T) lane-dense tile
        nz = noise_ref[0]      # (C, T)

        # forward(): x*2 - 1  fused with  diffusion.q_sample
        x_t = a * xt + b * nz - d

        # TODO(synk): the real eps predictor is the pretrained 256x256
        # guided-diffusion UNet (256x256_diffusion_uncond.pt); replaced by a
        # deterministic 1x1-conv surrogate.  C is tiny, so it runs as unrolled
        # VPU broadcast-FMAs instead of a K=N=4 MXU matmul.
        w_t = w_t_ref[...]                     # (C, C): w_t[c_out, c_in]
        eps = w_t[:, 0:1] * x_t[0:1, :]        # (C,1)*(1,T) -> (C,T)
        for ci in range(1, C):
            eps = eps + w_t[:, ci:ci + 1] * x_t[ci:ci + 1, :]

        # GaussianDiffusion._predict_xstart_from_eps with clip_denoised=True
        pred_x0 = jnp.clip(c2k * x_t - c3k * eps, -1.0, 1.0)

        # Fused classifier front-end: accumulate the global-average-pool sum of
        # pred_x0; the "(imgs+1)/2" rescale and the 1/HW mean are applied once in
        # the finalize epilogue (exact algebra, saves 2 VPU ops per element).
        acc_ref[...] += jnp.sum(pred_x0, axis=1, keepdims=True)   # (C, 1)

        @pl.when(h == n_h - 1)
        def _finalize():
            # TODO(synk): the real classifier is a pretrained ResNet-50; only its
            # terminal global-average-pool + FC structure is implemented here.
            pooled = (acc_ref[...] * inv_hw + 1.0) * 0.5                 # (C, 1)
            logits = jnp.sum(pooled * w_cls_ref[...], axis=0,
                             keepdims=True) + b_cls_ref[...]             # (1, NC)
            out_ref[0] = logits.astype(out_ref.dtype)

    logits = pl.pallas_call(
        kernel,
        out_shape=jax.ShapeDtypeStruct((B, 1, NC), jnp.float32),
        grid=(B, n_hw),
        in_specs=[
            pl.BlockSpec(memory_space=pltpu.MemorySpace.SMEM),          # coefs (scalars)
            pl.BlockSpec((1, C, tile_hw), lambda b, h: (b, 0, h)),      # x
            pl.BlockSpec((1, C, tile_hw), lambda b, h: (b, 0, h)),      # noise
            pl.BlockSpec((C, C), lambda b, h: (0, 0)),                  # w_eps^T (resident)
            pl.BlockSpec((C, NC), lambda b, h: (0, 0)),                 # w_cls (resident)
            pl.BlockSpec((1, NC), lambda b, h: (0, 0)),                 # b_cls (resident)
        ],
        out_specs=pl.BlockSpec((1, 1, NC), lambda b, h: (b, 0, 0)),     # logits (resident over h)
        scratch_shapes=[pltpu.VMEM((C, 1), jnp.float32)],               # pooled-sum accumulator
        compiler_params=pltpu.CompilerParams(
            dimension_semantics=("parallel", "arbitrary")),
    )(coefs, x, noise, w_eps_t, w_cls, b_cls)

    return logits.reshape(B, NC)


# ----------------------------------------------------------------------------- reference
def reference_forward(x_nchw, t, noise_nchw, params):
    """Pure-JAX reference of the same computation (NCHW)."""
    c0 = params["sqrt_alphas_cumprod"][t]
    c1 = params["sqrt_one_minus_alphas_cumprod"][t]
    c2 = params["sqrt_recip_alphas_cumprod"][t]
    c3 = params["sqrt_recipm1_alphas_cumprod"][t]
    x_in = x_nchw * 2.0 - 1.0
    x_t = c0 * x_in + c1 * noise_nchw
    eps = jnp.einsum("bchw,cd->bdhw", x_t, params["w_eps"])
    pred_x0 = jnp.clip(c2 * x_t - c3 * eps, -1.0, 1.0)
    imgs = (pred_x0 + 1.0) * 0.5
    pooled = jnp.mean(imgs, axis=(2, 3))                 # (B, C)
    return pooled @ params["w_cls"] + params["b_cls"]    # (B, NC)


# ----------------------------------------------------------------------------- main
if __name__ == "__main__":
    key = jax.random.PRNGKey(0)
    # Small stand-in for (batch, 3, 256, 256) ImageNet inputs.
    B, C, H, W = 2, 4, 16, 16
    NUM_CLASSES = 16
    t = 100

    k_x, k_n, k_w1, k_w2 = jax.random.split(key, 4)
    x = jax.random.uniform(k_x, (B, C, H, W), jnp.float32)        # images in [0, 1]
    noise = jax.random.normal(k_n, (B, C, H, W), jnp.float32)     # torch.randn_like(x)

    params = dict(
        make_diffusion_schedule(1000),
        w_eps=0.1 * jax.random.normal(k_w1, (C, C), jnp.float32),
        w_cls=0.1 * jax.random.normal(k_w2, (C, NUM_CLASSES), jnp.float32),
        b_cls=jnp.zeros((1, NUM_CLASSES), jnp.float32),
    )

    # tile_hw=128 -> grid (B, 2): exercises both the parallel batch axis and the
    # spatial-reduction (accumulator) axis.
    out = diffusion_robust_forward(x, t, noise, params, tile_hw=128)
    jax.block_until_ready(out)

    ref = reference_forward(x, t, noise, params)
    assert out.shape == (B, NUM_CLASSES), out.shape
    assert jnp.allclose(out, ref, rtol=2e-3, atol=2e-3), jnp.max(jnp.abs(out - ref))

    print("KERNEL_OK")
</pallas_src>

<mosaic_0001>
module attributes {stable_mosaic.version = 11 : i64} {
  func.func @kernel(%arg0: i32, %arg1: i32, %arg2: memref<5xf32, #tpu.memory_space<smem>>, %arg3: memref<1x4x128xf32, #tpu.memory_space<vmem>>, %arg4: memref<1x4x128xf32, #tpu.memory_space<vmem>>, %arg5: memref<4x4xf32, #tpu.memory_space<vmem>>, %arg6: memref<4x16xf32, #tpu.memory_space<vmem>>, %arg7: memref<1x16xf32, #tpu.memory_space<vmem>>, %arg8: memref<1x1x16xf32, #tpu.memory_space<vmem>>, %arg9: memref<4x1xf32, #tpu.memory_space<vmem>>) attributes {dimension_semantics = [#tpu.dimension_semantics<parallel>, #tpu.dimension_semantics<arbitrary>], iteration_bounds = array<i64: 2, 2>, scalar_prefetch = 0 : i64, scratch_operands = 1 : i64, tpu.core_type = #tpu.core_type<tc>, window_params = [{transform_indices = @transform_0, window_bounds = array<i64: 5>}, {transform_indices = @transform_1, window_bounds = array<i64: 1, 4, 128>}, {transform_indices = @transform_2, window_bounds = array<i64: 1, 4, 128>}, {pipeline_mode = #tpu.pipeline_mode<synchronous>, transform_indices = @transform_3, window_bounds = array<i64: 4, 4>}, {pipeline_mode = #tpu.pipeline_mode<synchronous>, transform_indices = @transform_4, window_bounds = array<i64: 4, 16>}, {pipeline_mode = #tpu.pipeline_mode<synchronous>, transform_indices = @transform_5, window_bounds = array<i64: 1, 16>}, {transform_indices = @transform_6, window_bounds = array<i64: 1, 1, 16>}]} {
    %c0_i32 = arith.constant 0 : i32
    %0 = arith.cmpi eq, %arg1, %c0_i32 : i32
    %1 = arith.extui %0 : i1 to i32
    %c0_i32_0 = arith.constant 0 : i32
    %2 = arith.cmpi ne, %1, %c0_i32_0 : i32
    scf.if %2 {
      %cst_16 = arith.constant 0.000000e+00 : f32
      %60 = vector.broadcast %cst_16 : f32 to vector<4x1xf32>
      %c0_17 = arith.constant 0 : index
      %c0_18 = arith.constant 0 : index
      %61 = vector.load %arg9[%c0_17, %c0_18] : memref<4x1xf32, #tpu.memory_space<vmem>>, vector<4x1xf32>
      tpu.vector_store %arg9[%c0_17, %c0_18], %60 {strides = array<i32>} : memref<4x1xf32, #tpu.memory_space<vmem>>, vector<4x1xf32>,
    } else {
    }
    %c0 = arith.constant 0 : index
    %3 = memref.load %arg2[%c0] : memref<5xf32, #tpu.memory_space<smem>>
    %c1 = arith.constant 1 : index
    %4 = memref.load %arg2[%c1] : memref<5xf32, #tpu.memory_space<smem>>
    %c2 = arith.constant 2 : index
    %5 = memref.load %arg2[%c2] : memref<5xf32, #tpu.memory_space<smem>>
    %c3 = arith.constant 3 : index
    %6 = memref.load %arg2[%c3] : memref<5xf32, #tpu.memory_space<smem>>
    %c4 = arith.constant 4 : index
    %7 = memref.load %arg2[%c4] : memref<5xf32, #tpu.memory_space<smem>>
    %c0_1 = arith.constant 0 : index
    %c0_2 = arith.constant 0 : index
    %c0_3 = arith.constant 0 : index
    %8 = vector.load %arg3[%c0_1, %c0_2, %c0_3] : memref<1x4x128xf32, #tpu.memory_space<vmem>>, vector<1x4x128xf32>
    %9 = vector.shape_cast %8 : vector<1x4x128xf32> to vector<4x128xf32>
    %c0_4 = arith.constant 0 : index
    %c0_5 = arith.constant 0 : index
    %c0_6 = arith.constant 0 : index
    %10 = vector.load %arg4[%c0_4, %c0_5, %c0_6] : memref<1x4x128xf32, #tpu.memory_space<vmem>>, vector<1x4x128xf32>
    %11 = vector.shape_cast %10 : vector<1x4x128xf32> to vector<4x128xf32>
    %12 = vector.broadcast %3 : f32 to vector<4x128xf32>
    %13 = arith.mulf %12, %9 : vector<4x128xf32>
    %14 = vector.broadcast %4 : f32 to vector<4x128xf32>
    %15 = arith.mulf %14, %11 : vector<4x128xf32>
    %16 = arith.addf %13, %15 : vector<4x128xf32>
    %17 = vector.broadcast %5 : f32 to vector<4x128xf32>
    %18 = arith.subf %16, %17 : vector<4x128xf32>
    %c0_7 = arith.constant 0 : index
    %c0_8 = arith.constant 0 : index
    %19 = vector.load %arg5[%c0_7, %c0_8] : memref<4x4xf32, #tpu.memory_space<vmem>>, vector<4x4xf32>
    %20 = vector.extract_strided_slice %19 {offsets = [0, 0], sizes = [4, 1], strides = [1, 1]} : vector<4x4xf32> to vector<4x1xf32>
    %21 = vector.extract_strided_slice %18 {offsets = [0, 0], sizes = [1, 128], strides = [1, 1]} : vector<4x128xf32> to vector<1x128xf32>
    %22 = vector.broadcast %20 : vector<4x1xf32> to vector<4x128xf32>
    %23 = vector.broadcast %21 : vector<1x128xf32> to vector<4x128xf32>
    %24 = arith.mulf %22, %23 : vector<4x128xf32>
    %25 = vector.extract_strided_slice %19 {offsets = [0, 1], sizes = [4, 1], strides = [1, 1]} : vector<4x4xf32> to vector<4x1xf32>
    %26 = vector.extract_strided_slice %18 {offsets = [1, 0], sizes = [1, 128], strides = [1, 1]} : vector<4x128xf32> to vector<1x128xf32>
    %27 = vector.broadcast %25 : vector<4x1xf32> to vector<4x128xf32>
    %28 = vector.broadcast %26 : vector<1x128xf32> to vector<4x128xf32>
    %29 = arith.mulf %27, %28 : vector<4x128xf32>
    %30 = arith.addf %24, %29 : vector<4x128xf32>
    %31 = vector.extract_strided_slice %19 {offsets = [0, 2], sizes = [4, 1], strides = [1, 1]} : vector<4x4xf32> to vector<4x1xf32>
    %32 = vector.extract_strided_slice %18 {offsets = [2, 0], sizes = [1, 128], strides = [1, 1]} : vector<4x128xf32> to vector<1x128xf32>
    %33 = vector.broadcast %31 : vector<4x1xf32> to vector<4x128xf32>
    %34 = vector.broadcast %32 : vector<1x128xf32> to vector<4x128xf32>
    %35 = arith.mulf %33, %34 : vector<4x128xf32>
    %36 = arith.addf %30, %35 : vector<4x128xf32>
    %37 = vector.extract_strided_slice %19 {offsets = [0, 3], sizes = [4, 1], strides = [1, 1]} : vector<4x4xf32> to vector<4x1xf32>
    %38 = vector.extract_strided_slice %18 {offsets = [3, 0], sizes = [1, 128], strides = [1, 1]} : vector<4x128xf32> to vector<1x128xf32>
    %39 = vector.broadcast %37 : vector<4x1xf32> to vector<4x128xf32>
    %40 = vector.broadcast %38 : vector<1x128xf32> to vector<4x128xf32>
    %41 = arith.mulf %39, %40 : vector<4x128xf32>
    %42 = arith.addf %36, %41 : vector<4x128xf32>
    %43 = vector.broadcast %6 : f32 to vector<4x128xf32>
    %44 = arith.mulf %43, %18 : vector<4x128xf32>
    %45 = vector.broadcast %7 : f32 to vector<4x128xf32>
    %46 = arith.mulf %45, %42 : vector<4x128xf32>
    %47 = arith.subf %44, %46 : vector<4x128xf32>
    %cst = arith.constant -1.000000e+00 : f32
    %cst_9 = arith.constant 1.000000e+00 : f32
    %48 = vector.broadcast %cst : f32 to vector<4x128xf32>
    %49 = arith.maximumf %48, %47 : vector<4x128xf32>
    %50 = vector.broadcast %cst_9 : f32 to vector<4x128xf32>
    %51 = arith.minimumf %50, %49 : vector<4x128xf32>
    %c0_10 = arith.constant 0 : index
    %c0_11 = arith.constant 0 : index
    %52 = vector.load %arg9[%c0_10, %c0_11] : memref<4x1xf32, #tpu.memory_space<vmem>>, vector<4x1xf32>
    %cst_12 = arith.constant dense<0.000000e+00> : vector<4xf32>
    %53 = vector.multi_reduction <add>, %51, %cst_12 [1] : vector<4x128xf32> to vector<4xf32>
    %54 = vector.shape_cast %53 : vector<4xf32> to vector<4x1xf32>
    %55 = arith.addf %52, %54 : vector<4x1xf32>
    %c0_13 = arith.constant 0 : index
    %c0_14 = arith.constant 0 : index
    %56 = vector.load %arg9[%c0_13, %c0_14] : memref<4x1xf32, #tpu.memory_space<vmem>>, vector<4x1xf32>
    tpu.vector_store %arg9[%c0_13, %c0_14], %55 {strides = array<i32>} : memref<4x1xf32, #tpu.memory_space<vmem>>, vector<4x1xf32>,
    %c1_i32 = arith.constant 1 : i32
    %57 = arith.cmpi eq, %arg1, %c1_i32 : i32
    %58 = arith.extui %57 : i1 to i32
    %c0_i32_15 = arith.constant 0 : i32
    %59 = arith.cmpi ne, %58, %c0_i32_15 : i32
    scf.if %59 {
      %c0_16 = arith.constant 0 : index
      %c0_17 = arith.constant 0 : index
      %60 = vector.load %arg9[%c0_16, %c0_17] : memref<4x1xf32, #tpu.memory_space<vmem>>, vector<4x1xf32>
      %cst_18 = arith.constant 3.906250e-03 : f32
      %61 = vector.broadcast %cst_18 : f32 to vector<4x1xf32>
      %62 = arith.mulf %60, %61 : vector<4x1xf32>
      %cst_19 = arith.constant 1.000000e+00 : f32
      %63 = vector.broadcast %cst_19 : f32 to vector<4x1xf32>
      %64 = arith.addf %62, %63 : vector<4x1xf32>
      %cst_20 = arith.constant 5.000000e-01 : f32
      %65 = vector.broadcast %cst_20 : f32 to vector<4x1xf32>
      %66 = arith.mulf %64, %65 : vector<4x1xf32>
      %c0_21 = arith.constant 0 : index
      %c0_22 = arith.constant 0 : index
      %67 = vector.load %arg6[%c0_21, %c0_22] : memref<4x16xf32, #tpu.memory_space<vmem>>, vector<4x16xf32>
      %68 = vector.broadcast %66 : vector<4x1xf32> to vector<4x16xf32>
      %69 = arith.mulf %68, %67 : vector<4x16xf32>
      %cst_23 = arith.constant dense<0.000000e+00> : vector<16xf32>
      %70 = vector.multi_reduction <add>, %69, %cst_23 [0] : vector<4x16xf32> to vector<16xf32>
      %71 = vector.shape_cast %70 : vector<16xf32> to vector<1x16xf32>
      %c0_24 = arith.constant 0 : index
      %c0_25 = arith.constant 0 : index
      %72 = vector.load %arg7[%c0_24, %c0_25] : memref<1x16xf32, #tpu.memory_space<vmem>>, vector<1x16xf32>
      %73 = arith.addf %71, %72 : vector<1x16xf32>
      %c0_26 = arith.constant 0 : index
      %c0_27 = arith.constant 0 : index
      %c0_28 = arith.constant 0 : index
      %74 = vector.load %arg8[%c0_26, %c0_27, %c0_28] : memref<1x1x16xf32, #tpu.memory_space<vmem>>, vector<1x1x16xf32>
      %75 = vector.shape_cast %74 : vector<1x1x16xf32> to vector<1x16xf32>
      %76 = vector.shape_cast %73 : vector<1x16xf32> to vector<1x1x16xf32>
      tpu.vector_store %arg8[%c0_26, %c0_27, %c0_28], %76 {strides = array<i32>} : memref<1x1x16xf32, #tpu.memory_space<vmem>>, vector<1x1x16xf32>,
    } else {
    }
    return
  }
  func.func @transform_0(%arg0: i32, %arg1: i32) -> i32 {
    %c0_i32 = arith.constant 0 : i32
    %c0_i32_0 = arith.constant 0 : i32
    return %c0_i32 : i32
  }
  func.func @transform_1(%arg0: i32, %arg1: i32) -> (i32, i32, i32) {
    %c0_i32 = arith.constant 0 : i32
    %c0_i32_0 = arith.constant 0 : i32
    return %arg0, %c0_i32, %arg1 : i32, i32, i32
  }
  func.func @transform_2(%arg0: i32, %arg1: i32) -> (i32, i32, i32) {
    %c0_i32 = arith.constant 0 : i32
    %c0_i32_0 = arith.constant 0 : i32
    return %arg0, %c0_i32, %arg1 : i32, i32, i32
  }
  func.func @transform_3(%arg0: i32, %arg1: i32) -> (i32, i32) {
    %c0_i32 = arith.constant 0 : i32
    %c0_i32_0 = arith.constant 0 : i32
    %c0_i32_1 = arith.constant 0 : i32
    return %c0_i32, %c0_i32_0 : i32, i32
  }
  func.func @transform_4(%arg0: i32, %arg1: i32) -> (i32, i32) {
    %c0_i32 = arith.constant 0 : i32
    %c0_i32_0 = arith.constant 0 : i32
    %c0_i32_1 = arith.constant 0 : i32
    return %c0_i32, %c0_i32_0 : i32, i32
  }
  func.func @transform_5(%arg0: i32, %arg1: i32) -> (i32, i32) {
    %c0_i32 = arith.constant 0 : i32
    %c0_i32_0 = arith.constant 0 : i32
    %c0_i32_1 = arith.constant 0 : i32
    return %c0_i32, %c0_i32_0 : i32, i32
  }
  func.func @transform_6(%arg0: i32, %arg1: i32) -> (i32, i32, i32) {
    %c0_i32 = arith.constant 0 : i32
    %c0_i32_0 = arith.constant 0 : i32
    %c0_i32_1 = arith.constant 0 : i32
    return %arg0, %c0_i32, %c0_i32_0 : i32, i32, i32
  }
}

</mosaic_0001>

<bundles_post_ra>
// kernel: tpu_custom_call.1
= control target key start
LH: loop header
LB: loop body
LE: loop exit
PB: predicated region body
PF: predicated region fallthrough
CT: control target
= control target key end

     0   :  { %s1284_s0 = inlined_call_operand.hbm [shape: f32[5], index: 0, kind: input, shape index: {}]   ;;  %s1285_s1 = inlined_call_operand.hbm [shape: f32[2,4,256], index: 1, kind: input, shape index: {}]   ;;  %s1286_s2 = inlined_call_operand.hbm [shape: f32[2,4,256], index: 2, kind: input, shape index: {}]   ;;  %s1287_s3 = inlined_call_operand.vmem [shape: f32[4,4], index: 3, kind: input, shape index: {}]   ;;  %s1288_s4 = inlined_call_operand.hbm [shape: f32[4,16], index: 4, kind: input, shape index: {}]   ;;  %s1289_s5 = inlined_call_operand.vmem [shape: f32[1,16], index: 5, kind: input, shape index: {}]   ;;  %s1290_s6 = inlined_call_operand.hbm [shape: f32[2,1,16], index: 6, kind: output, shape index: {}]  }
   0x1   :  { %1298 = sst [smem:[#allocation23_spill]] %s1284_s0 }
   0x2   :  { %1299 = sst [smem:[#allocation24_spill]] %s1287_s3 }
   0x3   :  { %1300 = sst [smem:[#allocation25_spill]] %s1288_s4 }
   0x4   :  { %1301 = sst [smem:[#allocation26_spill]] %s1289_s5 }
   0x5   :  { %1302 = sst [smem:[#allocation27_spill]] %s1290_s6 }
   0x6   :  { %11 = vsyncpa [#allocation6], 0 }
   0x7   :  { %12 = vsyncpa [#allocation4], 0 }
   0x8   :  { %14 = vsyncpa [#allocation4 + $0x1], 0 }
   0x9   :  { %15 = vsyncpa [#allocation9], 0 }
   0xa   :  { %17 = vsyncpa [#allocation9 + $0x1], 0 }
   0xb   :  { %18 = vsyncpa [#allocation5], 0 }
   0xc   :  { %20 = vsyncpa [#allocation5 + $0x1], 0  ;;  %s1028_s21 = smov 0   ;;  %s1030_s22 = smov 0  }
   0xd   :  { %s1032_s23 = smov 0   ;;  %s1034_s24 = smov 0  }
   0xe   :  { %s1036_s25 = smov 0   ;;  %s1038_s26 = smov 0  }
   0xf   :  { %s1040_s27 = smov 0   ;;  %s1042_s28 = smov 0  }
  0x10   :  { %s1044_s29 = smov 0   ;;  %s1046_s30 = smov 0  }
  0x11   :  { %s1048_s7 = smov 0  }
  0x12 LB: > { %1303 = sst [smem:[#allocation17_spill]] %s940_s21  ;;  %s1082_s8 = sadd.s32 4294967295, %s980_s7   ;;  %s980_s7 = sphi %s1048_s7, %s26_s7   ;;  %s976_s30 = sphi %s1046_s30, %s1338_s30   ;;  %s972_s29 = sphi %s1044_s29, %s1337_s29   ;;  %s968_s28 = sphi %s1042_s28, %s1336_s28   ;;  %s964_s27 = sphi %s1040_s27, %s1335_s27   ;;  %s960_s26 = sphi %s1038_s26, %s1334_s26   ;;  %s956_s25 = sphi %s1036_s25, %s1333_s25   ;;  %s952_s24 = sphi %s1034_s24, %s1332_s24   ;;  %s948_s23 = sphi %s1032_s23, %s1331_s23   ;;  %s944_s22 = sphi %s1030_s22, %s1330_s22   ;;  %s940_s21 = sphi %s1028_s21, %s1329_s21  }
  0x13   : > { %1304 = sst [smem:[#allocation18_spill]] %s964_s27  ;;  %s589_s9 = sadd.s32 4294967294, %s980_s7  }
  0x14   : > { %1305 = sst [smem:[#allocation19_spill]] %s968_s28  ;;  %p81_p0 = scmp.ne.s32.totalorder %s956_s25, %s952_s24 }
  0x15   : > { %p82_p1 = scmp.eq.s32.totalorder %s1082_s8, 0  ;;  %p195_p2 = scmp.ne.s32.totalorder %s948_s23, %s944_s22 }
  0x16   : > { %p196_p3 = scmp.eq.s32.totalorder %s1082_s8, 3  ;;  %p201_p5 = scmp.ne.s32.totalorder %s944_s22, %s940_s21 }
  0x17   : > { %p1092_p4 = por %p82_p1, %p81_p0  ;;  %p202_p7 = scmp.eq.s32.totalorder %s589_s9, 3 }
  0x18   : > { %p1098_p6 = por %p196_p3, %p195_p2  ;;  %p590_p8 = scmp.ge.s32.totalorder %s980_s7, 1 }
  0x19   : > { %p209_p9 = scmp.lt.s32.totalorder %s980_s7, 5  ;;  %p1104_p10 = por %p202_p7, %p201_p5 }
  0x1a   : > { %s1307_s11 = scalar_select %p1098_p6, 1, 0 }
  0x1b   : > { %s1309_s12 = scalar_select %p1104_p10, 1, 0 }
  0x1c   : > { %1308 = sst [smem:[#allocation20_spill]] %s1307_s11  ;;  %p1108_p11 = pnand %p590_p8, %p209_p9 }
  0x1d   : > { %1310 = sst [smem:[#allocation21_spill]] %s1309_s12  ;;  %s982_s14 = smov [#allocation10]  }
  0x1e   : > { %s234_s15 = sshll.u32 %s982_s14, 4  ;;  %p629_p12 = pneg %p1108_p11  ;;  %s235_s15 = int_to_ptr.vmem [resolvable:$true] %s234_s15 }
  0x1f   : > { %s766_s16 = scalar_lea.vmem %s235_s15, 64  ;;  %p774_p7 = scmp.lt.s32.totalorder %s235_s15, %s235_s15 }
  0x20   : > { %p630_p13 = pnand %p629_p12, %p82_p1  ;;  %p767_p2 = scmp.ne.s32.totalorder %s235_s15, %s766_s16 }
  0x21   : > { %p775_p6 = scmp.lt.s32.totalorder %s766_s16, %s766_s16 }
  0x22   : > { %p757_p0 = pneg %p630_p13 }
  0x23   : > { %p776_p10 = por %p775_p6, %p774_p7 }
  0x24   : > { %p769_p3 = pnand %p767_p2, %p757_p0 }
  0x26   : > { %p770_p5 = pneg %p769_p3 }
  0x28   : > { %p777_p8 = pnand %p776_p10, %p770_p5 }
  0x2a   : > { %780 = shalt.err (!%p777_p8)
}
  0x2b   : > { %s1312_s4 = sld [smem:[#allocation25_spill]]  ;;  %s983_s19 = smov [#allocation3]  }
  0x2c   : > { %s1313_s0 = sld [smem:[#allocation23_spill]]  ;;  %s35_s9 = sadd.s32 1, %s972_s29 }
  0x2d   : > { %p36_p6 = scmp.ge.s32.totalorder %s35_s9, 2  ;;  %s38_s14 = sadd.s32 1, %s976_s30 }
  0x2e   : > { %s68_s16 = sadd.s32 1, %s960_s26  ;;  %p75_p9 = scmp.ne.s32.totalorder %s960_s26, %s956_s25 }
  0x2f   : > { %s1340_s9 = smov (%p36_p6, %s35_s9), 0  ;;  %s1342_s14 = smov (!%p36_p6, %s38_s14), %s976_s30 }
  0x30   : > { %1314 = sst [smem:[#allocation22_spill]] %s1340_s9  ;;  %p76_p10 = scmp.eq.s32.totalorder %s980_s7, 0 }
  0x31   : > { %635 = dma.hbm_to_vmem [thread:$0]  (!%p630_p13), %s1312_s4, 64, %s235_s15, [#allocation9]  }
  0x32   : > { %632 = dma.hbm_to_smem (!%p630_p13), %s1313_s0, 16, %s983_s19, [#allocation6]  }
  0x33   : > { %s64_s15 = ssub.s32 %s972_s29, %s1340_s9  ;;  %p40_p12 = scmp.ge.s32.totalorder %s1342_s14, 2 }
  0x34   : > { %s185_s17 = sadd.s32 1, %s948_s23  ;;  %p1134_p0 = por %p76_p10, %p75_p9 }
  0x35   : > { %p649_p13 = scmp.lt.s32.totalorder %s980_s7, 4  ;;  %s1344_s14 = smov (%p40_p12, %s1342_s14), 0 }
  0x36   : > { %s248_s19 = sand.u32 1, %s960_s26   ;;  %s595_s20 = sshll.u32 %s976_s30, 1 }
  0x37   : > { %s63_s24 = ssub.s32 %s976_s30, %s1344_s14  ;;  %s1145_s4 = sshll.u32 %s248_s19, 2 }
  0x38   : > { %s65_s0 = sor.u32 %s64_s15, %s63_s24  ;;  %p183_p2 = scmp.eq.s32.totalorder %s63_s24, 0 }
  0x39   : > { %p66_p3 = scmp.eq.s32.totalorder %s65_s0, 0  ;;  %s257_s21 = sadd.s32 %s972_s29, %s595_s20 }
  0x3a   : > { %s1148_s9 = scalar_select %p183_p2, %s948_s23, %s185_s17  }
  0x3b   : > { %s1151_s12 = scalar_select %p66_p3, %s960_s26, %s68_s16  }
  0x3c   : > { %s596_s6 = sshll.u32 %s257_s21, 6  ;;  %s252_s11 = scalar_lea.vmem [#allocation7], %s1145_s4 }
  0x3d   : > { %s261_s28 = sshll.u32 %s252_s11, 4  ;;  %s259_s27 = scalar_lea.hbm %s1285_s1, %s596_s6  ;;  %s262_s28 = int_to_ptr.vmem [resolvable:$true] %s261_s28 }
  0x3e   : > { %p1162_p5 = pnand %p649_p13, %p1134_p0  ;;  %s1169_s16 = scalar_lea.hbm %s1286_s2, %s596_s6 }
  0x3f   : > { %s268_s21 = sand.u32 1, %s980_s7   ;;  %s249_s11 = scalar_lea.sflag [#allocation4], %s248_s19 }
  0x40   : > { %p794_p7 = pneg %p1162_p5  ;;  %s805_s3 = scalar_lea.vmem %s262_s28, 64 }
  0x41   : > { %p806_p8 = scmp.ne.s32.totalorder %s262_s28, %s805_s3  ;;  %s984_s5 = smov [#allocation7]  }
  0x42   : > { %s810_s18 = sshll.u32 %s984_s5, 4  ;;  %s811_s18 = int_to_ptr.vmem [resolvable:$false] %s810_s18 }
  0x43   : > { %p808_p6 = pnand %p806_p8, %p794_p7  ;;  %s812_s20 = scalar_lea.vmem %s811_s18, 128 }
  0x44   : > { %p813_p10 = scmp.lt.s32.totalorder %s262_s28, %s811_s18  ;;  %p814_p12 = scmp.lt.s32.totalorder %s812_s20, %s805_s3 }
  0x45   : > { %p809_p9 = pneg %p808_p6 }
  0x46   : > { %p815_p0 = por %p814_p12, %p813_p10 }
  0x48   : > { %p816_p13 = pnand %p815_p0, %p809_p9 }
  0x4a   : > { %819 = shalt.err (!%p816_p13)
}
  0x4b   : > { %639 = dma.hbm_to_vmem [thread:$0]  (!%p1162_p5), %s259_s27, 64, %s262_s28, %s249_s11  }
  0x4c   : > { %s272_s6 = scalar_lea.vmem [#allocation8], %s1145_s4  ;;  %s269_s24 = scalar_lea.sflag [#allocation9], %s268_s21 }
  0x4d   : > { %s281_s19 = sshll.u32 %s272_s6, 4  ;;  %s985_s17 = smov [#allocation8]   ;;  %s282_s19 = int_to_ptr.vmem [resolvable:$true] %s281_s19 }
  0x4e   : > { %s833_s15 = scalar_lea.vmem %s282_s19, 64  ;;  %s838_s3 = sshll.u32 %s985_s17, 4  ;;  %s839_s3 = int_to_ptr.vmem [resolvable:$false] %s838_s3 }
  0x4f   : > { %p834_p2 = scmp.ne.s32.totalorder %s282_s19, %s833_s15  ;;  %s840_s5 = scalar_lea.vmem %s839_s3, 128 }
  0x50   : > { %p841_p6 = scmp.lt.s32.totalorder %s282_s19, %s839_s3  ;;  %p842_p9 = scmp.lt.s32.totalorder %s840_s5, %s833_s15 }
  0x51   : > { %p836_p3 = pnand %p834_p2, %p794_p7 }
  0x52   : > { %p843_p10 = por %p842_p9, %p841_p6 }
  0x53   : > { %p837_p8 = pneg %p836_p3 }
  0x55   : > { %p844_p12 = pnand %p843_p10, %p837_p8 }
  0x57   : > { %847 = shalt.err (!%p844_p12)
}
  0x58   : > { %642 = dma.hbm_to_vmem [thread:$0]  (!%p1162_p5), %s1169_s16, 64, %s282_s19, %s269_s24  }
  0x59   : > { %290 = sbr.rel (%p1108_p11) target bundleno = 595 (0x253), region = 44 }
  0x5e   : > { %919 = dma.done.wait (%p82_p1), [#allocation6], 16  }
  0x5f   : > { %921 = vsyncadd (%p82_p1), [#allocation6], 4294967280  ;;  %s296_s4 = sand.u32 1, %s956_s25  }
  0x60   : > { %s1193_s27 = sshll.u32 %s296_s4, 2  ;;  %s297_s28 = scalar_lea.sflag [#allocation4], %s296_s4 }
  0x61   : > { %s300_s21 = scalar_lea.vmem [#allocation7], %s1193_s27 }
  0x62   : > { %923 = dma.done.wait (%p1092_p4), %s297_s28, 64  }
  0x63   : > { %925 = vsyncadd (%p1092_p4), %s297_s28, 4294967232  ;;  %s305_s13 = sand.u32 1, %s1082_s8   ;;  %s309_s16 = scalar_lea.vmem [#allocation8], %s1193_s27 }
  0x64   : > { %s306_s0 = scalar_lea.sflag [#allocation9], %s305_s13 }
  0x65   : > { %927 = dma.done.wait (%p1092_p4), %s306_s0, 64  }
  0x66   : > { %929 = vsyncadd (%p1092_p4), %s306_s0, 4294967232 }
  0x67   : > { %931 = dma.done.wait (%p82_p1), [#allocation9], 64  }
  0x68   : > { %933 = vsyncadd (%p82_p1), [#allocation9], 4294967232 }
  0x69   : > { %318 = sfence }
  0x6a   : > { %s345_s11 = sand.u32 1, %s944_s22   ;;  %s1317_s20 = sld [smem:[#allocation18_spill]] }
  0x6b   : > { %s1213_s18 = scalar_lea.vmem [#allocation11], %s345_s11 }
  0x70   : > { %p605_p11 = scmp.ne.s32.totalorder %s1317_s20, 0 }
  0x72   : > { %350 = sbr.rel (%p605_p11) target bundleno = 121 (0x79), region = 64 }
  0x77   : > { %vm351_vm0 = vcmask 3072   ;;  %v986_v0 = vmov 0.0  }
  0x78   : > { %352 = vst.msk [vmem:[#allocation2] sm:$0xf] %vm351_vm0, %v986_v0 }
  0x79 PF: > { %s1318_s19 = sld [smem:[#allocation24_spill]]  ;;  %v987_v2 = vmov 0   ;;  %v988_v3 = vmov 2   ;;  %v989_v4 = vmov 1   ;;  %v990_v5 = vmov 3  }
  0x7a   : > { %749 = vset.pattern.permute.xlu0 %v987_v2  ;;  %751 = vset.pattern.permute.xlu1 %v988_v3  ;;  %s353_s8 = sld [smem:[#allocation3]]  ;;  %v358_v6 = vld [vmem:[%s300_s21] sm:$0xf]  ;;  %v359_v7 = vld [vmem:[%s309_s16] sm:$0xf]  ;;  %v373_v10 = vlaneseq  ;;  %vm416_vm1 = vcmask 1043456  }
  0x7b   : > { %s606_s24 = sld [smem:[#allocation3 + $0x1]]  ;;  %vm421_vm2 = vcmask 3072  }
  0x7c   : > { %s607_s15 = sld [smem:[#allocation3 + $0x2]]  ;;  %v374_v13 = vshrl.u32 %v373_v10, 7 }
  0x7d   : > { %s608_s17 = sld [smem:[#allocation3 + $0x3]] }
  0x7e   : > { %v375_v16 = vsub.s32 0, %v374_v13  ;;  %v384_v18 = vsub.s32 1, %v374_v13  ;;  %v394_v20 = vsub.s32 2, %v374_v13  ;;  %v404_v22 = vsub.s32 3, %v374_v13  ;;  %s609_s3 = sld [smem:[#allocation3 + $0x4]] }
  0x7f   : > { %v367_v1 = vld [vmem:[%s1318_s19] sm:$0xf]  ;;  %s1319_s5 = sld [smem:[#allocation18_spill]] }
  0x80   : > { %370 = vperm.xlu0 %749, %v367_v1   ;;  %389 = vperm.xlu1 %751, %v367_v1   ;;  %v360_v8 = vstv %s353_s8  ;;  %v415_v43 = vld [vmem:[#allocation2] sm:$0xf] }
  0x81   : > { %v362_v9 = vstv %s606_s24  ;;  %v361_v11 = vmul.f32 %v360_v8, %v358_v6 }
  0x82   : > { %v363_v12 = vmul.f32 %v362_v9, %v359_v7  ;;  %v365_v15 = vstv %s607_s15 }
  0x83   : > { %v408_v34 = vstv %s608_s17 }
  0x84   : > { %750 = vset.pattern.permute.xlu0 %v989_v4  ;;  %752 = vset.pattern.permute.xlu1 %v990_v5  ;;  %v364_v14 = vadd.f32 %v363_v12, %v361_v11  ;;  %v410_v36 = vstv %s609_s3 }
  0x85   : > { %379 = vperm.xlu0 %750, %v367_v1   ;;  %399 = vperm.xlu1 %752, %v367_v1   ;;  %p611_p1 = scmp.ne.s32.totalorder %s1319_s5, 1 }
  0x86   : > { %v366_v17 = vsub.f32 %v364_v14, %v365_v15  ;;  %s1320_s28 = sld [smem:[#allocation26_spill]] (!%p611_p1) }
  0x88   : > { %v376_v23 = vrot.slane %v366_v17, %v375_v16  ;;  %v385_v24 = vrot.slane %v366_v17, %v384_v18  ;;  %v395_v25 = vrot.slane %v366_v17, %v394_v20  ;;  %v405_v26 = vrot.slane %v366_v17, %v404_v22 }
  0x89   : > { %753 = vset.pattern.permute.xlu0 %v990_v5  ;;  %v409_v38 = vmul.f32 %v408_v34, %v366_v17 }
  0xfb   : > { %v371_v19 = vpop.permute.xlu0 %370  ;;  %v390_v21 = vpop.permute.xlu1 %389 }
  0xfc   : > { %v377_v29 = vmul.f32 %v376_v23, %v371_v19  ;;  %v396_v31 = vmul.f32 %v395_v25, %v390_v21 }
 0x100   : > { %v380_v27 = vpop.permute.xlu0 %379  ;;  %v400_v28 = vpop.permute.xlu1 %399 }
 0x101   : > { %v386_v30 = vmul.f32 %v385_v24, %v380_v27  ;;  %v406_v33 = vmul.f32 %v405_v26, %v400_v28 }
 0x103   : > { %v387_v32 = vadd.f32 %v386_v30, %v377_v29 }
 0x105   : > { %v397_v35 = vadd.f32 %v396_v31, %v387_v32 }
 0x107   : > { %v407_v37 = vadd.f32 %v406_v33, %v397_v35 }
 0x109   : > { %v411_v39 = vmul.f32 %v410_v36, %v407_v37 }
 0x10b   : > { %v412_v40 = vsub.f32 %v409_v38, %v411_v39 }
 0x10d   : > { %v610_v41 = vclamps-f32 %v412_v40, 1.0 }
 0x10f   : > { %v417_v42 = vsel %vm416_vm1, %v610_v41, 0.0 }
 0x110   : > { %418 = vadd.xlane.f32.xlu1 %v417_v42 }
 0x198   : > { %426 = sbr.rel (%p611_p1) target bundleno = 568 (0x238), region = 68 }
 0x199   : > { %v419_v44 = vpop.xlane.xlu1 %418 }
 0x19a   : > { %v420_v45 = vadd.f32 %v419_v44, %v415_v43 }
 0x19c   : > { %422 = vst.msk [vmem:[#allocation2] sm:$0xf] %vm421_vm2, %v420_v45 }
 0x19d   : > { %v991_v47 = vmov 0   ;;  %v431_v51 = vld [vmem:[#allocation10] sm:$0xf]  ;;  %vm438_vm3 = vcmask 125952   ;;  %v446_v60 = vld [vmem:[%s1320_s28] sm:$0x1] }
 0x19e   : > { %754 = vset.pattern.permute.xlu0 %v991_v47  ;;  %vm448_vm4 = vcmask 122880  }
 0x1a3   : > { %v427_v46 = vld [vmem:[#allocation2] sm:$0xf] }
 0x1a4   : > { %v428_v48 = vmul.f32 0.00390625, %v427_v46 }
 0x1a6   : > { %v429_v49 = vadd.f32 1.0, %v428_v48 }
 0x1a8   : > { %v430_v50 = vmul.f32 0.5, %v429_v49 }
 0x1aa   : > { %434 = vperm.xlu0 %754, %v430_v50  }
 0x225   : > { %v435_v52 = vpop.permute.xlu0 %434 }
 0x226   : > { %v437_v53 = vmul.f32 %v435_v52, %v431_v51 }
 0x228   : > { %v439_v54 = vsel %vm438_vm3, %v437_v53, 0.0 }
 0x229   : > { %v440_v55 = vrot.slane %v439_v54, 4 }
 0x22b   : > { %v441_v56 = vadd.f32 %v440_v55, %v439_v54 }
 0x22d   : > { %v442_v57 = vrot.slane %v441_v56, 2 }
 0x22f   : > { %v443_v58 = vadd.f32 %v442_v57, %v441_v56 }
 0x231   : > { %v444_v59 = vrot.slane %v443_v58, 1 }
 0x233   : > { %v445_v61 = vadd.f32 %v444_v59, %v443_v58 }
 0x235   : > { %v447_v62 = vadd.f32 %v446_v60, %v445_v61 }
 0x237   : > { %449 = vst.msk [vmem:[%s1213_s18] sm:$0x1] %vm448_vm4, %v447_v62 }
 0x238 PF: > { %s1321_s21 = sld [smem:[#allocation19_spill]]  ;;  %s463_s19 = sshll.u32 %s1213_s18, 4  ;;  %s464_s19 = int_to_ptr.vmem [resolvable:$true] %s463_s19 }
 0x239   : > { %s1322_s13 = sld [smem:[#allocation20_spill]]  ;;  %s451_s8 = scalar_lea.sflag [#allocation5], %s345_s11 }
 0x23a   : > { %s1323_s10 = sld [smem:[#allocation27_spill]]  ;;  %s848_s24 = scalar_lea.vmem %s464_s19, 16 }
 0x23b   : > { %p849_p4 = scmp.ne.s32.totalorder %s464_s19, %s848_s24  ;;  %s992_s15 = smov [#allocation11]  }
 0x23c   : > { %s852_s17 = sshll.u32 %s992_s15, 4  ;;  %s853_s17 = int_to_ptr.vmem [resolvable:$false] %s852_s17 }
 0x23d   : > { %s854_s3 = scalar_lea.vmem %s853_s17, 32  ;;  %p855_p13 = scmp.lt.s32.totalorder %s464_s19, %s853_s17 }
 0x23e   : > { %s612_s0 = sshll.u32 %s1321_s21, 4  ;;  %p856_p2 = scmp.lt.s32.totalorder %s854_s3, %s848_s24 }
 0x23f   : > { %p1324_p5 = scmp.ne.s32.totalorder %s1322_s13, 0 }
 0x240   : > { %s461_s6 = scalar_lea.hbm %s1323_s10, %s612_s0  ;;  %p857_p3 = por %p856_p2, %p855_p13 }
 0x241   : > { %p850_p7 = pnand %p849_p4, %p1324_p5 }
 0x243   : > { %p851_p0 = pneg %p850_p7 }
 0x245   : > { %p858_p8 = pnand %p857_p3, %p851_p0 }
 0x247   : > { %861 = shalt.err (!%p858_p8)
}
 0x248   : > { %s862_s5 = scalar_lea.hbm %s461_s6, 16  ;;  %s866_s4 = scalar_lea.hbm %s1323_s10, 32 }
 0x249   : > { %p863_p6 = scmp.ne.s32.totalorder %s461_s6, %s862_s5  ;;  %p867_p12 = scmp.lt.s32.totalorder %s461_s6, %s1323_s10 }
 0x24a   : > { %p868_p11 = scmp.lt.s32.totalorder %s866_s4, %s862_s5 }
 0x24b   : > { %p864_p9 = pnand %p863_p6, %p1324_p5 }
 0x24c   : > { %p869_p1 = por %p868_p11, %p867_p12 }
 0x24d   : > { %p865_p10 = pneg %p864_p9 }
 0x24f   : > { %p870_p4 = pnand %p869_p1, %p865_p10 }
 0x251   : > { %873 = shalt.err (!%p870_p4)
}
 0x252   : > { %627 = dma.vmem_to_hbm [thread:$0]  (%p1324_p5), %s464_s19, 16, %s461_s6, %s451_s8  }
 0x253 PF: > { %s1325_s21 = sld [smem:[#allocation17_spill]]  ;;  %p652_p7 = scmp.ge.s32.totalorder %s980_s7, 2 }
 0x254   : > { %s1326_s0 = sld [smem:[#allocation21_spill]] }
 0x259   : > { %s475_s16 = sand.u32 1, %s1325_s21  }
 0x25a   : > { %p1327_p0 = scmp.ne.s32.totalorder %s1326_s0, 0  ;;  %s476_s20 = scalar_lea.sflag [#allocation5], %s475_s16 }
 0x25c   : > { %p644_p13 = pnand %p652_p7, %p1327_p0 }
 0x25e   : > { %p645_p2 = pneg %p644_p13 }
 0x260   : > { %935 = dma.done.wait (%p645_p2), %s476_s20, 16  }
 0x261   : > { %937 = vsyncadd (%p645_p2), %s476_s20, 4294967280  ;;  %s26_s7 = sadd.s32 1, %s980_s7   ;;  %s1328_s13 = sld [smem:[#allocation22_spill]] }
 0x262   : > { %p23_p3 = scmp.ge.s32.totalorder %s26_s7, 6   ;;  %s1329_s21 = smov %s944_s22 }
 0x263   : > { %s1330_s22 = smov %s948_s23  ;;  %s1331_s23 = smov %s1148_s9 }
 0x264   : > { %s1332_s24 = smov %s956_s25  ;;  %s1333_s25 = smov %s960_s26 }
 0x265   : > { %s1334_s26 = smov %s1151_s12  ;;  %s1335_s27 = smov %s972_s29 }
 0x266   : > { %s1336_s28 = smov %s976_s30  ;;  %s1338_s30 = smov %s1344_s14 }
 0x267   : > { %s1337_s29 = smov %s1328_s13  ;;  %25 = sbr.rel (!%p23_p3) target bundleno = 18 (0x12), region = 119 }
 0x26c   :  { %480 = vsyncpa [#allocation4], 1 }
 0x26d   :  { %482 = vsyncpa [#allocation4 + $0x1], 1 }
 0x26e   :  { %483 = vsyncpa [#allocation9], 1 }
 0x26f   :  { %485 = vsyncpa [#allocation9 + $0x1], 1 }
 0x270   :  { %486 = vsyncpa [#allocation5], 1 }
 0x271   :  { %488 = vsyncpa [#allocation5 + $0x1], 1 }
 0x272   :  { %489 = vsyncpa [#allocation6], 1 }
 0x273   :  { %491 = vsyncpa [#allocation6 + $0x1], 1 }

</bundles_post_ra>
